<compile_context>
chip_gen: v5e
topology: v5e:2x2
jax: 0.10.0
libtpu: 0.0.40
codegen_flags: <defaults>
</compile_context>

<pallas_src>
import numpy as np
import jax
import jax.numpy as jnp
from jax.experimental import pallas as pl
from jax.experimental.pallas import tpu as pltpu

FACTOR_NUM = 64
N_CORE_SPLIT = 2      # leading "parallel" grid axis (uses both v7x TensorCores)
# Per grid step: 3 slabs * 2 groups * 64 * tile * 4 B, double-buffered
# ~= 6 MiB at tile=2048 -- comfortably under the scoped VMEM default on every
# generation; larger tiles buy nothing (per-step overhead already amortized).
MAX_TILE_ROWS = 2048


# ----------------------------------------------------------------------------
# Fused Pallas kernel: both BPR groups, rows on the lane axis.
# ----------------------------------------------------------------------------
def _bpr_stats(u_s, p_s, n_s, *, n_valid, n_male, tile, n_rt):
    """u_s / p_s / n_s: (2, F, Bp) f32, rows on the lane axis, zero padded.

    Returns (N_CORE_SPLIT, 8, tile) f32 lane-dense partial sums; summing over
    axes (0, 2) yields
      [loss_main, loss_male, loss_female, sum u0^2, sum p0^2,
       sum male_like^2, sum female_like^2, unused].
    n_valid (=B) and n_male (=Nm) are trace-time Python ints (jit specializes
    on the batch shapes anyway), so they are baked into the kernel.
    """
    _, F, Bp = u_s.shape
    del Bp

    def kernel(u_ref, p_ref, n_ref, out_ref):
        c = pl.program_id(0)
        rt = pl.program_id(1)

        @pl.when(rt == 0)
        def _init():
            out_ref[...] = jnp.zeros_like(out_ref)

        # Row indices of this tile (rows live on the lane axis).
        base = (c * n_rt + rt) * tile
        lane = jax.lax.broadcasted_iota(jnp.int32, (1, tile), 1) + base
        valid = (lane < n_valid).astype(jnp.float32)     # rows < B
        male = (lane < n_male).astype(jnp.float32)       # rows < Nm
        female = valid - male                            # Nm <= rows < B

        def neg_log_sigmoid(x):
            # softplus(-x) == -log(sigmoid(x)); stable, lane-dense (1, tile).
            # (log(1+e) with e in (0,1] is accurate enough in f32 here.)
            return jnp.maximum(-x, 0.0) + jnp.log(1.0 + jnp.exp(-jnp.abs(x)))

        # group 0: main BPR (u_emb, add_emb, add_emb_j)
        u0, p0, n0 = u_ref[0], p_ref[0], n_ref[0]
        x0 = jnp.sum(u0 * (p0 - n0), axis=0, keepdims=True)   # (1, tile)
        loss0 = valid * neg_log_sigmoid(x0)
        u0sq = jnp.sum(u0 * u0, axis=0, keepdims=True)
        p0sq = jnp.sum(p0 * p0, axis=0, keepdims=True)

        # group 1: [male ; female] rows (u_emb, fake_pos like, j_emb)
        u1, p1, n1 = u_ref[1], p_ref[1], n_ref[1]
        x1 = jnp.sum(u1 * (p1 - n1), axis=0, keepdims=True)
        l1 = neg_log_sigmoid(x1)
        p1sq = jnp.sum(p1 * p1, axis=0, keepdims=True)

        partials = (loss0, male * l1, female * l1,
                    u0sq, p0sq, male * p1sq, female * p1sq)
        # Place each (1, tile) partial on its own sublane row -> one dense
        # (8, tile) VPU update of the resident accumulator per grid step.
        row = jax.lax.broadcasted_iota(jnp.int32, (8, tile), 0)
        part = jnp.zeros((8, tile), jnp.float32)
        for k, v in enumerate(partials):
            part = part + jnp.where(row == k, v, 0.0)
        out_ref[...] = out_ref[...] + part[None, :, :]

    row_block = lambda c, rt: (0, 0, c * n_rt + rt)
    return pl.pallas_call(
        kernel,
        out_shape=jax.ShapeDtypeStruct((N_CORE_SPLIT, 8, tile), jnp.float32),
        grid=(N_CORE_SPLIT, n_rt),
        in_specs=[pl.BlockSpec((2, F, tile), row_block),
                  pl.BlockSpec((2, F, tile), row_block),
                  pl.BlockSpec((2, F, tile), row_block)],
        # each core owns its own resident (1, 8, tile) accumulator block
        out_specs=pl.BlockSpec((1, 8, tile), lambda c, rt: (c, 0, 0)),
        compiler_params=pltpu.CompilerParams(
            dimension_semantics=("parallel", "arbitrary")),
    )(u_s, p_s, n_s)


def _plan_tiling(batch):
    """Rows-on-lanes tiling: tile is a multiple of 128, split over 2 cores."""
    per_core = -(-batch // N_CORE_SPLIT)
    tile = max(128, min(MAX_TILE_ROWS, ((per_core + 127) // 128) * 128))
    n_rt = -(-batch // (N_CORE_SPLIT * tile))
    return tile, n_rt, N_CORE_SPLIT * n_rt * tile


# ----------------------------------------------------------------------------
# fake_pos (avg_len == 1, shapes concrete at trace time).
# ----------------------------------------------------------------------------
def fake_pos(male_noise_i_emb, female_noise_i_emb, factor_num):
    male_len = male_noise_i_emb.shape[0]
    female_len = female_noise_i_emb.shape[0]
    avg_len = 1

    male_end_idx = male_len % avg_len + avg_len            # == 1
    male_mean = male_noise_i_emb[:-male_end_idx].reshape(-1, avg_len, factor_num).mean(axis=1)
    male_noise_len = male_mean.shape[0]
    if male_noise_len > female_len:
        female_like = male_mean[:female_len]
    else:
        expand_len = female_len // male_noise_len + 1
        female_like = jnp.tile(male_mean, (expand_len, 1))[:female_len]

    female_end_idx = female_len % avg_len + avg_len        # == 1
    female_mean = female_noise_i_emb[:-female_end_idx].reshape(-1, avg_len, factor_num).mean(axis=1)
    female_noise_len = female_mean.shape[0]
    if female_noise_len > male_len:
        male_like = female_mean[:male_len]
    else:
        expand_len = male_len // female_noise_len + 1
        male_like = jnp.tile(female_mean, (expand_len, 1))[:male_len]
    return male_like, female_like


# ----------------------------------------------------------------------------
# Jitted numeric path: gathers + packing + fused kernel + final combine.
# ----------------------------------------------------------------------------
@jax.jit
def _forward_jit(user_emb, item_emb, noise_item,
                 u_idx, i_idx, j_idx,
                 male_u, female_u, male_i, female_i, male_j, female_j):
    F = FACTOR_NUM
    noise_emb = jnp.clip(item_emb, -1.0, 1.0) + noise_item

    B = u_idx.shape[0]
    Nm = male_u.shape[0]
    Nf = female_u.shape[0]
    len_noise = int(B * 0.4)

    u_emb = user_emb[u_idx]
    i_emb = item_emb[i_idx]
    j_emb = item_emb[j_idx]
    noise_i = noise_emb[i_idx]
    noise_j = noise_emb[j_idx]
    add_emb = jnp.concatenate([i_emb[:-len_noise], noise_i[-len_noise:]], axis=0)
    add_emb_j = jnp.concatenate([noise_j[-len_noise:], j_emb[:-len_noise]], axis=0)

    male_like, female_like = fake_pos(noise_emb[male_i], noise_emb[female_i], F)

    # male + female folded into ONE B-row group (Nm + Nf == B)
    u1 = jnp.concatenate([user_emb[male_u], user_emb[female_u]], axis=0)
    p1 = jnp.concatenate([male_like, female_like], axis=0)
    n1 = jnp.concatenate([item_emb[male_j], item_emb[female_j]], axis=0)

    tile, n_rt, Bp = _plan_tiling(B)

    def pack(a0, a1):
        # (B, F) x2 -> (2, F, Bp): rows on the lane axis, zero padded.
        # TODO(synk): a gather that writes the transposed layout directly
        # would save this one extra HBM pass per slab.
        s = jnp.swapaxes(jnp.stack([a0, a1], axis=0), 1, 2)   # (2, F, B)
        return jnp.pad(s, ((0, 0), (0, 0), (0, Bp - B)))

    stats = _bpr_stats(pack(u_emb, u1), pack(add_emb, p1), pack(add_emb_j, n1),
                       n_valid=B, n_male=Nm, tile=tile, n_rt=n_rt)
    s = jnp.sum(stats, axis=(0, 2))                 # (8,) over cores & lanes

    # j_emb only feeds one L2 sum -> plain XLA reduce, no extra pad/stream.
    sum_j2 = jnp.sum(jnp.square(j_emb))

    loss_add = s[0] / B
    l2_regulization = 0.01 * (s[3] + s[4] + sum_j2) / B
    loss_fake = s[1] / Nm + s[2] / Nf
    l2_regulization2 = 0.01 * (s[5] / Nm + s[6] / Nf)
    loss_task = 1.0 * loss_add + l2_regulization
    loss_add_item = loss_fake + l2_regulization2
    return loss_task, l2_regulization, loss_add_item


# ----------------------------------------------------------------------------
# FairData.forward equivalent (host glue with data-dependent shapes).
# ----------------------------------------------------------------------------
def fair_data_forward(params, users_features, u_batch, i_batch, j_batch):
    # TODO(synk): torch.masked_select yields data-dependent shapes; the gender
    # split is resolved host-side with numpy and the jitted graph simply
    # re-specializes if (B, Nm, Nf) change between batches.
    u_np = np.asarray(u_batch)
    i_np = np.asarray(i_batch)
    j_np = np.asarray(j_batch)
    gender = np.asarray(users_features)[u_np]
    male_mask = gender.astype(bool)
    female_mask = (1 - gender).astype(bool)

    B = int(u_np.shape[0])
    Nm = int(male_mask.sum())
    Nf = int(female_mask.sum())
    if int(B * 0.4) < 1:
        raise ValueError("batch too small: len_noise == 0 breaks add_emb "
                         "construction (mirrors the original module)")
    if Nm < 2 or Nf < 2:
        raise ValueError("batch needs >= 2 users of each gender (otherwise the "
                         "original module's fake_pos breaks)")

    as_i32 = lambda a: jnp.asarray(a, dtype=jnp.int32)
    loss_task, l2_reg, loss_add_item = _forward_jit(
        params["embed_user"], params["embed_item"], params["noise_item"],
        as_i32(u_np), as_i32(i_np), as_i32(j_np),
        as_i32(u_np[male_mask]), as_i32(u_np[female_mask]),
        as_i32(i_np[male_mask]), as_i32(i_np[female_mask]),
        as_i32(j_np[male_mask]), as_i32(j_np[female_mask]))
    return [loss_task, l2_reg, loss_add_item]


# ----------------------------------------------------------------------------
# Pure-numpy (float64) end-to-end reference — only used by the test in __main__.
# ----------------------------------------------------------------------------
def _forward_ref_numpy(params, users_features, u_batch, i_batch, j_batch):
    F = FACTOR_NUM
    user_emb = np.asarray(params["embed_user"], np.float64)
    item_emb = np.asarray(params["embed_item"], np.float64)
    noise_emb = np.clip(item_emb, -1.0, 1.0) + np.asarray(params["noise_item"], np.float64)

    u_np, i_np, j_np = (np.asarray(a) for a in (u_batch, i_batch, j_batch))
    gender = np.asarray(users_features)[u_np]
    male_mask = gender.astype(bool)
    female_mask = (1 - gender).astype(bool)

    B = u_np.shape[0]
    len_noise = int(B * 0.4)
    u_emb = user_emb[u_np]
    i_emb = item_emb[i_np]
    j_emb = item_emb[j_np]
    ni = noise_emb[i_np]
    nj = noise_emb[j_np]
    add_emb = np.concatenate([i_emb[:-len_noise], ni[-len_noise:]], 0)
    add_emb_j = np.concatenate([nj[-len_noise:], j_emb[:-len_noise]], 0)

    male_i, female_i = i_np[male_mask], i_np[female_mask]
    male_j, female_j = j_np[male_mask], j_np[female_mask]
    male_u, female_u = u_np[male_mask], u_np[female_mask]

    def fake_pos_np(m_emb, f_emb):
        male_len, female_len = m_emb.shape[0], f_emb.shape[0]
        avg_len = 1
        male_mean = m_emb[:-(male_len % avg_len + avg_len)].reshape(-1, avg_len, F).mean(1)
        mn = male_mean.shape[0]
        female_like = (male_mean[:female_len] if mn > female_len
                       else np.tile(male_mean, (female_len // mn + 1, 1))[:female_len])
        female_mean = f_emb[:-(female_len % avg_len + avg_len)].reshape(-1, avg_len, F).mean(1)
        fn = female_mean.shape[0]
        male_like = (female_mean[:male_len] if fn > male_len
                     else np.tile(female_mean, (male_len // fn + 1, 1))[:male_len])
        return male_like, female_like

    male_like, female_like = fake_pos_np(noise_emb[male_i], noise_emb[female_i])
    male_j_emb, female_j_emb = item_emb[male_j], item_emb[female_j]
    male_u_emb, female_u_emb = user_emb[male_u], user_emb[female_u]

    def neg_log_sigmoid(x):   # == softplus(-x)
        return np.maximum(-x, 0.0) + np.log1p(np.exp(-np.abs(x)))

    x_main = (u_emb * add_emb).sum(-1) - (u_emb * add_emb_j).sum(-1)
    loss_add = neg_log_sigmoid(x_main).mean()
    l2 = 0.01 * (u_emb ** 2 + add_emb ** 2 + j_emb ** 2).sum(-1).mean()
    x_m = (male_u_emb * male_like).sum(-1) - (male_u_emb * male_j_emb).sum(-1)
    x_f = (female_u_emb * female_like).sum(-1) - (female_u_emb * female_j_emb).sum(-1)
    loss_fake = neg_log_sigmoid(x_m).mean() + neg_log_sigmoid(x_f).mean()
    l2_2 = 0.01 * (male_like ** 2).sum(-1).mean() + 0.01 * (female_like ** 2).sum(-1).mean()
    return [loss_add + l2, l2, loss_fake + l2_2]


if __name__ == "__main__":
    # small synthetic shapes consistent with the module
    user_num, item_num, factor_num = 16, 24, FACTOR_NUM
    batch = 8

    key = jax.random.PRNGKey(0)
    k_u, k_i, k_n, k_ib, k_jb = jax.random.split(key, 5)

    params = {
        "embed_user": 0.01 * jax.random.normal(k_u, (user_num, factor_num), jnp.float32),
        "embed_item": 0.01 * jax.random.normal(k_i, (item_num, factor_num), jnp.float32),
        "noise_item": 0.01 * jax.random.normal(k_n, (item_num, factor_num), jnp.float32),
    }
    # users_features -> gender bit per user (deterministic, both genders present)
    users_features = jnp.arange(user_num, dtype=jnp.int32) % 2

    u_batch = jnp.arange(batch, dtype=jnp.int32) % user_num
    i_batch = jax.random.randint(k_ib, (batch,), 0, item_num, dtype=jnp.int32)
    j_batch = jax.random.randint(k_jb, (batch,), 0, item_num, dtype=jnp.int32)

    losses = fair_data_forward(params, users_features, u_batch, i_batch, j_batch)
    losses = [jax.block_until_ready(l) for l in losses]

    # correctness check kept OUT of the forward hot path
    ref = _forward_ref_numpy(params, users_features, u_batch, i_batch, j_batch)
    np.testing.assert_allclose(np.array([float(l) for l in losses]),
                               np.array(ref, dtype=np.float64),
                               rtol=2e-4, atol=1e-6)

    print("KERNEL_OK")
</pallas_src>

<mosaic_0001>
module attributes {stable_mosaic.version = 11 : i64} {
  func.func @kernel(%arg0: i32, %arg1: i32, %arg2: memref<2x64x128xf32, #tpu.memory_space<vmem>>, %arg3: memref<2x64x128xf32, #tpu.memory_space<vmem>>, %arg4: memref<2x64x128xf32, #tpu.memory_space<vmem>>, %arg5: memref<1x8x128xf32, #tpu.memory_space<vmem>>) attributes {dimension_semantics = [#tpu.dimension_semantics<parallel>, #tpu.dimension_semantics<arbitrary>], iteration_bounds = array<i64: 2, 1>, scalar_prefetch = 0 : i64, scratch_operands = 0 : i64, tpu.core_type = #tpu.core_type<tc>, window_params = [{transform_indices = @transform_0, window_bounds = array<i64: 2, 64, 128>}, {transform_indices = @transform_1, window_bounds = array<i64: 2, 64, 128>}, {transform_indices = @transform_2, window_bounds = array<i64: 2, 64, 128>}, {transform_indices = @transform_3, window_bounds = array<i64: 1, 8, 128>}]} {
    %c0_i32 = arith.constant 0 : i32
    %0 = arith.cmpi eq, %arg1, %c0_i32 : i32
    %1 = arith.extui %0 : i1 to i32
    %c0_i32_0 = arith.constant 0 : i32
    %2 = arith.cmpi ne, %1, %c0_i32_0 : i32
    scf.if %2 {
      %cst_46 = arith.constant 0.000000e+00 : f32
      %131 = vector.broadcast %cst_46 : f32 to vector<1x8x128xf32>
      %c0_47 = arith.constant 0 : index
      %c0_48 = arith.constant 0 : index
      %c0_49 = arith.constant 0 : index
      %132 = vector.load %arg5[%c0_47, %c0_48, %c0_49] : memref<1x8x128xf32, #tpu.memory_space<vmem>>, vector<1x8x128xf32>
      tpu.vector_store %arg5[%c0_47, %c0_48, %c0_49], %131 {strides = array<i32>} : memref<1x8x128xf32, #tpu.memory_space<vmem>>, vector<1x8x128xf32>,
    } else {
    }
    %c1_i32 = arith.constant 1 : i32
    %3 = arith.muli %arg0, %c1_i32 : i32
    %4 = arith.addi %3, %arg1 : i32
    %c128_i32 = arith.constant 128 : i32
    %5 = arith.muli %4, %c128_i32 : i32
    %6 = tpu.iota {dimensions = array<i32: 1>} : vector<1x128xi32>
    %7 = vector.broadcast %5 : i32 to vector<1x128xi32>
    %8 = arith.addi %6, %7 : vector<1x128xi32>
    %c8_i32 = arith.constant 8 : i32
    %9 = vector.broadcast %c8_i32 : i32 to vector<1x128xi32>
    %10 = arith.cmpi slt, %8, %9 : vector<1x128xi32>
    %11 = arith.extui %10 : vector<1x128xi1> to vector<1x128xi32>
    %12 = arith.sitofp %11 : vector<1x128xi32> to vector<1x128xf32>
    %c4_i32 = arith.constant 4 : i32
    %13 = vector.broadcast %c4_i32 : i32 to vector<1x128xi32>
    %14 = arith.cmpi slt, %8, %13 : vector<1x128xi32>
    %15 = arith.extui %14 : vector<1x128xi1> to vector<1x128xi32>
    %16 = arith.sitofp %15 : vector<1x128xi32> to vector<1x128xf32>
    %17 = arith.subf %12, %16 : vector<1x128xf32>
    %c0 = arith.constant 0 : index
    %c0_1 = arith.constant 0 : index
    %c0_2 = arith.constant 0 : index
    %18 = vector.load %arg2[%c0, %c0_1, %c0_2] : memref<2x64x128xf32, #tpu.memory_space<vmem>>, vector<1x64x128xf32>
    %19 = vector.shape_cast %18 : vector<1x64x128xf32> to vector<64x128xf32>
    %c0_3 = arith.constant 0 : index
    %c0_4 = arith.constant 0 : index
    %c0_5 = arith.constant 0 : index
    %20 = vector.load %arg3[%c0_3, %c0_4, %c0_5] : memref<2x64x128xf32, #tpu.memory_space<vmem>>, vector<1x64x128xf32>
    %21 = vector.shape_cast %20 : vector<1x64x128xf32> to vector<64x128xf32>
    %c0_6 = arith.constant 0 : index
    %c0_7 = arith.constant 0 : index
    %c0_8 = arith.constant 0 : index
    %22 = vector.load %arg4[%c0_6, %c0_7, %c0_8] : memref<2x64x128xf32, #tpu.memory_space<vmem>>, vector<1x64x128xf32>
    %23 = vector.shape_cast %22 : vector<1x64x128xf32> to vector<64x128xf32>
    %24 = arith.subf %21, %23 : vector<64x128xf32>
    %25 = arith.mulf %19, %24 : vector<64x128xf32>
    %cst = arith.constant dense<0.000000e+00> : vector<128xf32>
    %26 = vector.multi_reduction <add>, %25, %cst [0] : vector<64x128xf32> to vector<128xf32>
    %27 = vector.shape_cast %26 : vector<128xf32> to vector<1x128xf32>
    %cst_9 = arith.constant 0.000000e+00 : f32
    %28 = vector.broadcast %cst_9 : f32 to vector<1x128xf32>
    %29 = arith.subf %28, %27 : vector<1x128xf32>
    %cst_10 = arith.constant 0.000000e+00 : f32
    %30 = vector.broadcast %cst_10 : f32 to vector<1x128xf32>
    %31 = arith.maximumf %29, %30 : vector<1x128xf32>
    %32 = math.absf %27 : vector<1x128xf32>
    %cst_11 = arith.constant 0.000000e+00 : f32
    %33 = vector.broadcast %cst_11 : f32 to vector<1x128xf32>
    %34 = arith.subf %33, %32 : vector<1x128xf32>
    %35 = math.exp %34 : vector<1x128xf32>
    %cst_12 = arith.constant 1.000000e+00 : f32
    %36 = vector.broadcast %cst_12 : f32 to vector<1x128xf32>
    %37 = arith.addf %36, %35 : vector<1x128xf32>
    %38 = math.log %37 : vector<1x128xf32>
    %39 = arith.addf %31, %38 : vector<1x128xf32>
    %40 = arith.mulf %12, %39 : vector<1x128xf32>
    %41 = arith.mulf %19, %19 : vector<64x128xf32>
    %cst_13 = arith.constant dense<0.000000e+00> : vector<128xf32>
    %42 = vector.multi_reduction <add>, %41, %cst_13 [0] : vector<64x128xf32> to vector<128xf32>
    %43 = vector.shape_cast %42 : vector<128xf32> to vector<1x128xf32>
    %44 = arith.mulf %21, %21 : vector<64x128xf32>
    %cst_14 = arith.constant dense<0.000000e+00> : vector<128xf32>
    %45 = vector.multi_reduction <add>, %44, %cst_14 [0] : vector<64x128xf32> to vector<128xf32>
    %46 = vector.shape_cast %45 : vector<128xf32> to vector<1x128xf32>
    %c1 = arith.constant 1 : index
    %c0_15 = arith.constant 0 : index
    %c0_16 = arith.constant 0 : index
    %47 = vector.load %arg2[%c1, %c0_15, %c0_16] : memref<2x64x128xf32, #tpu.memory_space<vmem>>, vector<1x64x128xf32>
    %48 = vector.shape_cast %47 : vector<1x64x128xf32> to vector<64x128xf32>
    %c1_17 = arith.constant 1 : index
    %c0_18 = arith.constant 0 : index
    %c0_19 = arith.constant 0 : index
    %49 = vector.load %arg3[%c1_17, %c0_18, %c0_19] : memref<2x64x128xf32, #tpu.memory_space<vmem>>, vector<1x64x128xf32>
    %50 = vector.shape_cast %49 : vector<1x64x128xf32> to vector<64x128xf32>
    %c1_20 = arith.constant 1 : index
    %c0_21 = arith.constant 0 : index
    %c0_22 = arith.constant 0 : index
    %51 = vector.load %arg4[%c1_20, %c0_21, %c0_22] : memref<2x64x128xf32, #tpu.memory_space<vmem>>, vector<1x64x128xf32>
    %52 = vector.shape_cast %51 : vector<1x64x128xf32> to vector<64x128xf32>
    %53 = arith.subf %50, %52 : vector<64x128xf32>
    %54 = arith.mulf %48, %53 : vector<64x128xf32>
    %cst_23 = arith.constant dense<0.000000e+00> : vector<128xf32>
    %55 = vector.multi_reduction <add>, %54, %cst_23 [0] : vector<64x128xf32> to vector<128xf32>
    %56 = vector.shape_cast %55 : vector<128xf32> to vector<1x128xf32>
    %cst_24 = arith.constant 0.000000e+00 : f32
    %57 = vector.broadcast %cst_24 : f32 to vector<1x128xf32>
    %58 = arith.subf %57, %56 : vector<1x128xf32>
    %cst_25 = arith.constant 0.000000e+00 : f32
    %59 = vector.broadcast %cst_25 : f32 to vector<1x128xf32>
    %60 = arith.maximumf %58, %59 : vector<1x128xf32>
    %61 = math.absf %56 : vector<1x128xf32>
    %cst_26 = arith.constant 0.000000e+00 : f32
    %62 = vector.broadcast %cst_26 : f32 to vector<1x128xf32>
    %63 = arith.subf %62, %61 : vector<1x128xf32>
    %64 = math.exp %63 : vector<1x128xf32>
    %cst_27 = arith.constant 1.000000e+00 : f32
    %65 = vector.broadcast %cst_27 : f32 to vector<1x128xf32>
    %66 = arith.addf %65, %64 : vector<1x128xf32>
    %67 = math.log %66 : vector<1x128xf32>
    %68 = arith.addf %60, %67 : vector<1x128xf32>
    %69 = arith.mulf %50, %50 : vector<64x128xf32>
    %cst_28 = arith.constant dense<0.000000e+00> : vector<128xf32>
    %70 = vector.multi_reduction <add>, %69, %cst_28 [0] : vector<64x128xf32> to vector<128xf32>
    %71 = vector.shape_cast %70 : vector<128xf32> to vector<1x128xf32>
    %72 = arith.mulf %16, %68 : vector<1x128xf32>
    %73 = arith.mulf %17, %68 : vector<1x128xf32>
    %74 = arith.mulf %16, %71 : vector<1x128xf32>
    %75 = arith.mulf %17, %71 : vector<1x128xf32>
    %76 = tpu.iota {dimensions = array<i32: 0>} : vector<8x128xi32>
    %cst_29 = arith.constant 0.000000e+00 : f32
    %77 = vector.broadcast %cst_29 : f32 to vector<8x128xf32>
    %c0_i32_30 = arith.constant 0 : i32
    %78 = vector.broadcast %c0_i32_30 : i32 to vector<8x128xi32>
    %79 = arith.cmpi eq, %76, %78 : vector<8x128xi32>
    %cst_31 = arith.constant 0.000000e+00 : f32
    %80 = vector.shape_cast %40 : vector<1x128xf32> to vector<1x128xf32>
    %81 = vector.broadcast %80 : vector<1x128xf32> to vector<8x128xf32>
    %82 = vector.broadcast %cst_31 : f32 to vector<8x128xf32>
    %83 = arith.select %79, %81, %82 : vector<8x128xi1>, vector<8x128xf32>
    %84 = arith.addf %77, %83 : vector<8x128xf32>
    %c1_i32_32 = arith.constant 1 : i32
    %85 = vector.broadcast %c1_i32_32 : i32 to vector<8x128xi32>
    %86 = arith.cmpi eq, %76, %85 : vector<8x128xi32>
    %cst_33 = arith.constant 0.000000e+00 : f32
    %87 = vector.shape_cast %72 : vector<1x128xf32> to vector<1x128xf32>
    %88 = vector.broadcast %87 : vector<1x128xf32> to vector<8x128xf32>
    %89 = vector.broadcast %cst_33 : f32 to vector<8x128xf32>
    %90 = arith.select %86, %88, %89 : vector<8x128xi1>, vector<8x128xf32>
    %91 = arith.addf %84, %90 : vector<8x128xf32>
    %c2_i32 = arith.constant 2 : i32
    %92 = vector.broadcast %c2_i32 : i32 to vector<8x128xi32>
    %93 = arith.cmpi eq, %76, %92 : vector<8x128xi32>
    %cst_34 = arith.constant 0.000000e+00 : f32
    %94 = vector.shape_cast %73 : vector<1x128xf32> to vector<1x128xf32>
    %95 = vector.broadcast %94 : vector<1x128xf32> to vector<8x128xf32>
    %96 = vector.broadcast %cst_34 : f32 to vector<8x128xf32>
    %97 = arith.select %93, %95, %96 : vector<8x128xi1>, vector<8x128xf32>
    %98 = arith.addf %91, %97 : vector<8x128xf32>
    %c3_i32 = arith.constant 3 : i32
    %99 = vector.broadcast %c3_i32 : i32 to vector<8x128xi32>
    %100 = arith.cmpi eq, %76, %99 : vector<8x128xi32>
    %cst_35 = arith.constant 0.000000e+00 : f32
    %101 = vector.shape_cast %43 : vector<1x128xf32> to vector<1x128xf32>
    %102 = vector.broadcast %101 : vector<1x128xf32> to vector<8x128xf32>
    %103 = vector.broadcast %cst_35 : f32 to vector<8x128xf32>
    %104 = arith.select %100, %102, %103 : vector<8x128xi1>, vector<8x128xf32>
    %105 = arith.addf %98, %104 : vector<8x128xf32>
    %c4_i32_36 = arith.constant 4 : i32
    %106 = vector.broadcast %c4_i32_36 : i32 to vector<8x128xi32>
    %107 = arith.cmpi eq, %76, %106 : vector<8x128xi32>
    %cst_37 = arith.constant 0.000000e+00 : f32
    %108 = vector.shape_cast %46 : vector<1x128xf32> to vector<1x128xf32>
    %109 = vector.broadcast %108 : vector<1x128xf32> to vector<8x128xf32>
    %110 = vector.broadcast %cst_37 : f32 to vector<8x128xf32>
    %111 = arith.select %107, %109, %110 : vector<8x128xi1>, vector<8x128xf32>
    %112 = arith.addf %105, %111 : vector<8x128xf32>
    %c5_i32 = arith.constant 5 : i32
    %113 = vector.broadcast %c5_i32 : i32 to vector<8x128xi32>
    %114 = arith.cmpi eq, %76, %113 : vector<8x128xi32>
    %cst_38 = arith.constant 0.000000e+00 : f32
    %115 = vector.shape_cast %74 : vector<1x128xf32> to vector<1x128xf32>
    %116 = vector.broadcast %115 : vector<1x128xf32> to vector<8x128xf32>
    %117 = vector.broadcast %cst_38 : f32 to vector<8x128xf32>
    %118 = arith.select %114, %116, %117 : vector<8x128xi1>, vector<8x128xf32>
    %119 = arith.addf %112, %118 : vector<8x128xf32>
    %c6_i32 = arith.constant 6 : i32
    %120 = vector.broadcast %c6_i32 : i32 to vector<8x128xi32>
    %121 = arith.cmpi eq, %76, %120 : vector<8x128xi32>
    %cst_39 = arith.constant 0.000000e+00 : f32
    %122 = vector.shape_cast %75 : vector<1x128xf32> to vector<1x128xf32>
    %123 = vector.broadcast %122 : vector<1x128xf32> to vector<8x128xf32>
    %124 = vector.broadcast %cst_39 : f32 to vector<8x128xf32>
    %125 = arith.select %121, %123, %124 : vector<8x128xi1>, vector<8x128xf32>
    %126 = arith.addf %119, %125 : vector<8x128xf32>
    %c0_40 = arith.constant 0 : index
    %c0_41 = arith.constant 0 : index
    %c0_42 = arith.constant 0 : index
    %127 = vector.load %arg5[%c0_40, %c0_41, %c0_42] : memref<1x8x128xf32, #tpu.memory_space<vmem>>, vector<1x8x128xf32>
    %128 = vector.shape_cast %126 : vector<8x128xf32> to vector<1x8x128xf32>
    %129 = arith.addf %127, %128 : vector<1x8x128xf32>
    %c0_43 = arith.constant 0 : index
    %c0_44 = arith.constant 0 : index
    %c0_45 = arith.constant 0 : index
    %130 = vector.load %arg5[%c0_43, %c0_44, %c0_45] : memref<1x8x128xf32, #tpu.memory_space<vmem>>, vector<1x8x128xf32>
    tpu.vector_store %arg5[%c0_43, %c0_44, %c0_45], %129 {strides = array<i32>} : memref<1x8x128xf32, #tpu.memory_space<vmem>>, vector<1x8x128xf32>,
    return
  }
  func.func @transform_0(%arg0: i32, %arg1: i32) -> (i32, i32, i32) {
    %c1_i32 = arith.constant 1 : i32
    %0 = arith.muli %arg0, %c1_i32 : i32
    %1 = arith.addi %0, %arg1 : i32
    %c0_i32 = arith.constant 0 : i32
    %c0_i32_0 = arith.constant 0 : i32
    %c0_i32_1 = arith.constant 0 : i32
    return %c0_i32, %c0_i32_0, %1 : i32, i32, i32
  }
  func.func @transform_1(%arg0: i32, %arg1: i32) -> (i32, i32, i32) {
    %c1_i32 = arith.constant 1 : i32
    %0 = arith.muli %arg0, %c1_i32 : i32
    %1 = arith.addi %0, %arg1 : i32
    %c0_i32 = arith.constant 0 : i32
    %c0_i32_0 = arith.constant 0 : i32
    %c0_i32_1 = arith.constant 0 : i32
    return %c0_i32, %c0_i32_0, %1 : i32, i32, i32
  }
  func.func @transform_2(%arg0: i32, %arg1: i32) -> (i32, i32, i32) {
    %c1_i32 = arith.constant 1 : i32
    %0 = arith.muli %arg0, %c1_i32 : i32
    %1 = arith.addi %0, %arg1 : i32
    %c0_i32 = arith.constant 0 : i32
    %c0_i32_0 = arith.constant 0 : i32
    %c0_i32_1 = arith.constant 0 : i32
    return %c0_i32, %c0_i32_0, %1 : i32, i32, i32
  }
  func.func @transform_3(%arg0: i32, %arg1: i32) -> (i32, i32, i32) {
    %c0_i32 = arith.constant 0 : i32
    %c0_i32_0 = arith.constant 0 : i32
    %c0_i32_1 = arith.constant 0 : i32
    return %arg0, %c0_i32, %c0_i32_0 : i32, i32, i32
  }
}

</mosaic_0001>

<bundles_post_ra>
// kernel: tile.14
= control target key start
LH: loop header
LB: loop body
LE: loop exit
PB: predicated region body
PF: predicated region fallthrough
CT: control target
= control target key end

     0   :  { %vm11_vm0 = vcmask 523264   ;;  %s42_s0 = inlined_call_operand.vmem [shape: f32[2,3,64], index: 0, kind: input, shape index: {}]   ;;  %s43_s1 = inlined_call_operand.vmem [shape: f32[6,64], index: 1, kind: output, shape index: {}]  }
   0x1   :  { %v18_v0 = vld [vmem:[%s42_s0 + $0x4] sm:$0xf]  ;;  %v8_v1 = vld [vmem:[%s42_s0] sm:$0xf] }
   0x2   :  { %7 = vst [vmem:[#allocation0 + $0x8] sm:$0xf] %v18_v0 }
   0x3   :  { %9 = vst [vmem:[#allocation0] sm:$0xf] %v8_v1 }
   0x9   :  { %v14_v2 = vld [vmem:[#allocation0 + $0x8] sm:$0x7]  }
   0xa   :  { %v10_v3 = vld [vmem:[#allocation0] sm:$0x7]   ;;  %19 = vst.msk [vmem:[%s43_s1 + $0x3] sm:$0x7] %vm11_vm0, %v14_v2  }
   0xb   :  { %12 = vst.msk [vmem:[%s43_s1] sm:$0x7] %vm11_vm0, %v10_v3  }

// kernel: _forward_jit.1
= control target key start
LH: loop header
LB: loop body
LE: loop exit
PB: predicated region body
PF: predicated region fallthrough
CT: control target
= control target key end

     0   :  { %s1019_s12 = smov 0   ;;  %s1021_s13 = smov 0   ;;  %s1309_s0 = inlined_call_operand.vmem [shape: f32[2,64,256], index: 0, kind: input, shape index: {}]   ;;  %s1310_s1 = inlined_call_operand.vmem [shape: f32[2,64,256], index: 1, kind: input, shape index: {}]   ;;  %s1311_s2 = inlined_call_operand.vmem [shape: f32[2,64,256], index: 2, kind: input, shape index: {}]   ;;  %s1312_s3 = inlined_call_operand.vmem [shape: f32[2,8,128], index: 3, kind: output, shape index: {}]  }
   0x1   :  { %s1023_s14 = smov 0   ;;  %s1025_s15 = smov 0  }
   0x2   :  { %s1027_s16 = smov 0  }
   0x3 LB: > { %s25_s17 = sadd.s32 1, %s992_s15  ;;  %p41_p1 = scmp.ne.s32.totalorder %s984_s13, %s980_s12  ;;  %s996_s16 = sphi %s1027_s16, %s13_s16   ;;  %s992_s15 = sphi %s1025_s15, %s1317_s15   ;;  %s988_s14 = sphi %s1023_s14, %s1316_s14   ;;  %s984_s13 = sphi %s1021_s13, %s1315_s13   ;;  %s980_s12 = sphi %s1019_s12, %s1314_s12  }
   0x4   : > { %p27_p0 = scmp.ge.s32.totalorder %s25_s17, 2  ;;  %p42_p2 = scmp.eq.s32.totalorder %s996_s16, 0 }
   0x5   : > { %s34_s20 = sadd.s32 1, %s984_s13  ;;  %p868_p5 = scmp.ge.s32.totalorder %s996_s16, 2 }
   0x6   : > { %s1319_s17 = smov (%p27_p0, %s25_s17), 0  ;;  %p1050_p3 = por %p42_p2, %p41_p1 }
   0x7   : > { %s31_s19 = ssub.s32 %s992_s15, %s1319_s17  ;;  %149 = sbr.rel (%p868_p5) target bundleno = 72 (0x48), region = 16 }
   0x8   : > { %p32_p4 = scmp.eq.s32.totalorder %s31_s19, 0 }
   0xa   : > { %s1058_s21 = scalar_select %p32_p4, %s984_s13, %s34_s20  }
   0xc   : > { %152 = sbr.rel (!%p1050_p3) target bundleno = 32 (0x20), region = 20  ;;  %s154_s22 = sand.u32 (%p1050_p3), 1, %s984_s13  }
   0xd   : > { %s870_s23 = sshll.u32 (%p1050_p3), %s992_s15, 3  ;;  %s869_s24 = sshll.u32 (%p1050_p3), %s154_s22, 7 }
   0xe   : > { %s1068_s27 = scalar_lea.vmem (%p1050_p3), %s1309_s0, %s870_s23  ;;  %s156_s28 = scalar_lea.vmem (%p1050_p3), [#allocation2], %s869_s24 }
   0xf   : > { %v218_v0 = vld [vmem:[%s1068_s27] sm:$0xff] (%p1050_p3)  ;;  %v220_v1 = vld [vmem:[%s1068_s27 + $0x10] sm:$0xff] (%p1050_p3) }
  0x10   : > { %v222_v2 = vld [vmem:[%s1068_s27 + $0x20] sm:$0xff] (%p1050_p3)  ;;  %219 = vst [vmem:[%s156_s28] sm:$0xff] (%p1050_p3), %v218_v0  ;;  %v224_v3 = vld [vmem:[%s1068_s27 + $0x30] sm:$0xff] (%p1050_p3) }
  0x11   : > { %221 = vst [vmem:[%s156_s28 + $0x8] sm:$0xff] %v220_v1  ;;  %v226_v4 = vld [vmem:[%s1068_s27 + $0x40] sm:$0xff]  ;;  %v228_v5 = vld [vmem:[%s1068_s27 + $0x50] sm:$0xff] }
  0x12   : > { %223 = vst [vmem:[%s156_s28 + $0x10] sm:$0xff] %v222_v2  ;;  %v230_v6 = vld [vmem:[%s1068_s27 + $0x60] sm:$0xff]  ;;  %v232_v7 = vld [vmem:[%s1068_s27 + $0x70] sm:$0xff] }
  0x13   : > { %225 = vst [vmem:[%s156_s28 + $0x18] sm:$0xff] %v224_v3  ;;  %v234_v8 = vld [vmem:[%s1068_s27 + $0x80] sm:$0xff]  ;;  %v236_v9 = vld [vmem:[%s1068_s27 + $0x90] sm:$0xff] }
  0x14   : > { %227 = vst [vmem:[%s156_s28 + $0x20] sm:$0xff] %v226_v4  ;;  %v238_v10 = vld [vmem:[%s1068_s27 + $0xa0] sm:$0xff]  ;;  %v240_v11 = vld [vmem:[%s1068_s27 + $0xb0] sm:$0xff] }
  0x15   : > { %229 = vst [vmem:[%s156_s28 + $0x28] sm:$0xff] %v228_v5  ;;  %v242_v12 = vld [vmem:[%s1068_s27 + $0xc0] sm:$0xff]  ;;  %v244_v13 = vld [vmem:[%s1068_s27 + $0xd0] sm:$0xff] }
  0x16   : > { %231 = vst [vmem:[%s156_s28 + $0x30] sm:$0xff] %v230_v6  ;;  %v246_v14 = vld [vmem:[%s1068_s27 + $0xe0] sm:$0xff]  ;;  %v248_v15 = vld [vmem:[%s1068_s27 + $0xf0] sm:$0xff] }
  0x17   : > { %233 = vst [vmem:[%s156_s28 + $0x38] sm:$0xff] %v232_v7 }
  0x18   : > { %235 = vst [vmem:[%s156_s28 + $0x40] sm:$0xff] %v234_v8 }
  0x19   : > { %237 = vst [vmem:[%s156_s28 + $0x48] sm:$0xff] %v236_v9 }
  0x1a   : > { %239 = vst [vmem:[%s156_s28 + $0x50] sm:$0xff] %v238_v10 }
  0x1b   : > { %241 = vst [vmem:[%s156_s28 + $0x58] sm:$0xff] %v240_v11 }
  0x1c   : > { %243 = vst [vmem:[%s156_s28 + $0x60] sm:$0xff] %v242_v12 }
  0x1d   : > { %245 = vst [vmem:[%s156_s28 + $0x68] sm:$0xff] %v244_v13 }
  0x1e   : > { %247 = vst [vmem:[%s156_s28 + $0x70] sm:$0xff] %v246_v14 }
  0x1f   : > { %249 = vst [vmem:[%s156_s28 + $0x78] sm:$0xff] %v248_v15 }
  0x20 PF: > { %255 = sbr.rel (!%p1050_p3) target bundleno = 52 (0x34), region = 58  ;;  %s257_s29 = sand.u32 (%p1050_p3), 1, %s984_s13  }
  0x21   : > { %s872_s30 = sshll.u32 (%p1050_p3), %s992_s15, 3  ;;  %s871_s4 = sshll.u32 (%p1050_p3), %s257_s29, 7 }
  0x22   : > { %s1093_s7 = scalar_lea.vmem (%p1050_p3), %s1310_s1, %s872_s30  ;;  %s259_s8 = scalar_lea.vmem (%p1050_p3), [#allocation3], %s871_s4 }
  0x23   : > { %v321_v16 = vld [vmem:[%s1093_s7] sm:$0xff] (%p1050_p3)  ;;  %v323_v17 = vld [vmem:[%s1093_s7 + $0x10] sm:$0xff] (%p1050_p3) }
  0x24   : > { %v325_v18 = vld [vmem:[%s1093_s7 + $0x20] sm:$0xff] (%p1050_p3)  ;;  %322 = vst [vmem:[%s259_s8] sm:$0xff] (%p1050_p3), %v321_v16  ;;  %v327_v19 = vld [vmem:[%s1093_s7 + $0x30] sm:$0xff] (%p1050_p3) }
  0x25   : > { %324 = vst [vmem:[%s259_s8 + $0x8] sm:$0xff] %v323_v17  ;;  %v329_v20 = vld [vmem:[%s1093_s7 + $0x40] sm:$0xff]  ;;  %v331_v21 = vld [vmem:[%s1093_s7 + $0x50] sm:$0xff] }
  0x26   : > { %326 = vst [vmem:[%s259_s8 + $0x10] sm:$0xff] %v325_v18  ;;  %v333_v22 = vld [vmem:[%s1093_s7 + $0x60] sm:$0xff]  ;;  %v335_v23 = vld [vmem:[%s1093_s7 + $0x70] sm:$0xff] }
  0x27   : > { %328 = vst [vmem:[%s259_s8 + $0x18] sm:$0xff] %v327_v19  ;;  %v337_v24 = vld [vmem:[%s1093_s7 + $0x80] sm:$0xff]  ;;  %v339_v25 = vld [vmem:[%s1093_s7 + $0x90] sm:$0xff] }
  0x28   : > { %330 = vst [vmem:[%s259_s8 + $0x20] sm:$0xff] %v329_v20  ;;  %v341_v26 = vld [vmem:[%s1093_s7 + $0xa0] sm:$0xff]  ;;  %v343_v27 = vld [vmem:[%s1093_s7 + $0xb0] sm:$0xff] }
  0x29   : > { %332 = vst [vmem:[%s259_s8 + $0x28] sm:$0xff] %v331_v21  ;;  %v345_v28 = vld [vmem:[%s1093_s7 + $0xc0] sm:$0xff]  ;;  %v347_v29 = vld [vmem:[%s1093_s7 + $0xd0] sm:$0xff] }
  0x2a   : > { %334 = vst [vmem:[%s259_s8 + $0x30] sm:$0xff] %v333_v22  ;;  %v349_v30 = vld [vmem:[%s1093_s7 + $0xe0] sm:$0xff]  ;;  %v351_v31 = vld [vmem:[%s1093_s7 + $0xf0] sm:$0xff] }
  0x2b   : > { %336 = vst [vmem:[%s259_s8 + $0x38] sm:$0xff] %v335_v23 }
  0x2c   : > { %338 = vst [vmem:[%s259_s8 + $0x40] sm:$0xff] %v337_v24 }
  0x2d   : > { %340 = vst [vmem:[%s259_s8 + $0x48] sm:$0xff] %v339_v25 }
  0x2e   : > { %342 = vst [vmem:[%s259_s8 + $0x50] sm:$0xff] %v341_v26 }
  0x2f   : > { %344 = vst [vmem:[%s259_s8 + $0x58] sm:$0xff] %v343_v27 }
  0x30   : > { %346 = vst [vmem:[%s259_s8 + $0x60] sm:$0xff] %v345_v28 }
  0x31   : > { %348 = vst [vmem:[%s259_s8 + $0x68] sm:$0xff] %v347_v29 }
  0x32   : > { %350 = vst [vmem:[%s259_s8 + $0x70] sm:$0xff] %v349_v30 }
  0x33   : > { %352 = vst [vmem:[%s259_s8 + $0x78] sm:$0xff] %v351_v31 }
  0x34 PF: > { %358 = sbr.rel (!%p1050_p3) target bundleno = 72 (0x48), region = 96  ;;  %s360_s9 = sand.u32 (%p1050_p3), 1, %s984_s13  }
  0x35   : > { %s874_s10 = sshll.u32 (%p1050_p3), %s992_s15, 3  ;;  %s873_s11 = sshll.u32 (%p1050_p3), %s360_s9, 7 }
  0x36   : > { %s1118_s22 = scalar_lea.vmem (%p1050_p3), %s1311_s2, %s874_s10  ;;  %s362_s18 = scalar_lea.vmem (%p1050_p3), [#allocation4], %s873_s11 }
  0x37   : > { %v424_v32 = vld [vmem:[%s1118_s22] sm:$0xff] (%p1050_p3)  ;;  %v426_v33 = vld [vmem:[%s1118_s22 + $0x10] sm:$0xff] (%p1050_p3) }
  0x38   : > { %v428_v34 = vld [vmem:[%s1118_s22 + $0x20] sm:$0xff] (%p1050_p3)  ;;  %425 = vst [vmem:[%s362_s18] sm:$0xff] (%p1050_p3), %v424_v32  ;;  %v430_v35 = vld [vmem:[%s1118_s22 + $0x30] sm:$0xff] (%p1050_p3) }
  0x39   : > { %427 = vst [vmem:[%s362_s18 + $0x8] sm:$0xff] %v426_v33  ;;  %v432_v36 = vld [vmem:[%s1118_s22 + $0x40] sm:$0xff]  ;;  %v434_v37 = vld [vmem:[%s1118_s22 + $0x50] sm:$0xff] }
  0x3a   : > { %429 = vst [vmem:[%s362_s18 + $0x10] sm:$0xff] %v428_v34  ;;  %v436_v38 = vld [vmem:[%s1118_s22 + $0x60] sm:$0xff]  ;;  %v438_v39 = vld [vmem:[%s1118_s22 + $0x70] sm:$0xff] }
  0x3b   : > { %431 = vst [vmem:[%s362_s18 + $0x18] sm:$0xff] %v430_v35  ;;  %v440_v40 = vld [vmem:[%s1118_s22 + $0x80] sm:$0xff]  ;;  %v442_v41 = vld [vmem:[%s1118_s22 + $0x90] sm:$0xff] }
  0x3c   : > { %433 = vst [vmem:[%s362_s18 + $0x20] sm:$0xff] %v432_v36  ;;  %v444_v42 = vld [vmem:[%s1118_s22 + $0xa0] sm:$0xff]  ;;  %v446_v43 = vld [vmem:[%s1118_s22 + $0xb0] sm:$0xff] }
  0x3d   : > { %435 = vst [vmem:[%s362_s18 + $0x28] sm:$0xff] %v434_v37  ;;  %v448_v44 = vld [vmem:[%s1118_s22 + $0xc0] sm:$0xff]  ;;  %v450_v45 = vld [vmem:[%s1118_s22 + $0xd0] sm:$0xff] }
  0x3e   : > { %437 = vst [vmem:[%s362_s18 + $0x30] sm:$0xff] %v436_v38  ;;  %v452_v46 = vld [vmem:[%s1118_s22 + $0xe0] sm:$0xff]  ;;  %v454_v47 = vld [vmem:[%s1118_s22 + $0xf0] sm:$0xff] }
  0x3f   : > { %439 = vst [vmem:[%s362_s18 + $0x38] sm:$0xff] %v438_v39 }
  0x40   : > { %441 = vst [vmem:[%s362_s18 + $0x40] sm:$0xff] %v440_v40 }
  0x41   : > { %443 = vst [vmem:[%s362_s18 + $0x48] sm:$0xff] %v442_v41 }
  0x42   : > { %445 = vst [vmem:[%s362_s18 + $0x50] sm:$0xff] %v444_v42 }
  0x43   : > { %447 = vst [vmem:[%s362_s18 + $0x58] sm:$0xff] %v446_v43 }
  0x44   : > { %449 = vst [vmem:[%s362_s18 + $0x60] sm:$0xff] %v448_v44 }
  0x45   : > { %451 = vst [vmem:[%s362_s18 + $0x68] sm:$0xff] %v450_v45 }
  0x46   : > { %453 = vst [vmem:[%s362_s18 + $0x70] sm:$0xff] %v452_v46 }
  0x47   : > { %455 = vst [vmem:[%s362_s18 + $0x78] sm:$0xff] %v454_v47 }
  0x48 PF: > { %p875_p6 = scmp.ge.s32.totalorder %s996_s16, 1  ;;  %p460_p7 = scmp.lt.s32.totalorder %s996_s16, 3 }
  0x4a   : > { %p461_p8 = pnand %p875_p6, %p460_p7 }
  0x4b   : > { %s467_s23 = sand.u32 (!%p461_p8), 1, %s980_s12   ;;  %s880_s27 = sshll.u32 (!%p461_p8), %s988_s14, 7 }
  0x4c   : > { %464 = sbr.rel (%p461_p8) target bundleno = 167 (0xa7), region = 134  ;;  %s876_s24 = sshll.u32 (!%p461_p8), %s467_s23, 7 }
  0x4d   : > { %s1139_s25 = scalar_lea.vmem (!%p461_p8), [#allocation2], %s876_s24  ;;  %s1144_s26 = scalar_lea.vmem (!%p461_p8), [#allocation3], %s876_s24 }
  0x4e   : > { %s1167_s12 = scalar_lea.vmem (!%p461_p8), [#allocation4], %s876_s24  ;;  %p514_p9 = scmp.lt.s32.totalorder (!%p461_p8), %s988_s14, 1 }
  0x51   : > { %v1142_v48 = vld [vmem:[%s1139_s25] sm:$0xff]  ;;  %v1150_v50 = vld [vmem:[%s1144_s26 + $0x8] sm:$0xff]  ;;  %v1156_v52 = vld [vmem:[%s1139_s25 + $0x10] sm:$0xff]  ;;  %s1321_s14 = smov (!%p514_p9, %s988_s14), 1 }
  0x52   : > { %v1147_v49 = vld [vmem:[%s1144_s26] sm:$0xff]  ;;  %v1153_v51 = vld [vmem:[%s1139_s25 + $0x8] sm:$0xff]  ;;  %v1159_v53 = vld [vmem:[%s1144_s26 + $0x10] sm:$0xff]  ;;  %s879_s28 = sshll.u32 %s1321_s14, 3 }
  0x53   : > { %v1162_v54 = vld [vmem:[%s1144_s26 + $0x18] sm:$0xff]  ;;  %v1165_v55 = vld [vmem:[%s1144_s26 + $0x20] sm:$0xff]  ;;  %v553_v57 = vld [vmem:[%s1167_s12 + $0x8] sm:$0xff]  ;;  %s517_s4 = scalar_lea.vmem %s1312_s3, %s879_s28 }
  0x54   : > { %v552_v56 = vld [vmem:[%s1167_s12] sm:$0xff]  ;;  %v554_v58 = vld [vmem:[%s1167_s12 + $0x10] sm:$0xff]  ;;  %v555_v59 = vld [vmem:[%s1167_s12 + $0x18] sm:$0xff]  ;;  %v561_v62 = vsub.f32 %v1150_v50, %v553_v57 }
  0x55   : > { %v556_v60 = vld [vmem:[%s1167_s12 + $0x20] sm:$0xff]  ;;  %v560_v61 = vsub.f32 %v1147_v49, %v552_v56  ;;  %v562_v63 = vsub.f32 %v1159_v53, %v554_v58  ;;  %v563_v0 = vsub.f32 %v1162_v54, %v555_v59  ;;  %v1179_v1 = vld [vmem:[%s1139_s25 + $0x18] sm:$0xff]  ;;  %v1182_v2 = vld [vmem:[%s1144_s26 + $0x28] sm:$0xff] }
  0x56   : > { %v557_v3 = vld [vmem:[%s1167_s12 + $0x28] sm:$0xff]  ;;  %v564_v5 = vsub.f32 %v1165_v55, %v556_v60  ;;  %v569_v6 = vmul.f32 %v561_v62, %v1153_v51  ;;  %v1190_v8 = vld [vmem:[%s1139_s25 + $0x20] sm:$0xff]  ;;  %v1193_v9 = vld [vmem:[%s1144_s26 + $0x30] sm:$0xff] }
  0x57   : > { %v568_v4 = vmul.f32 %v560_v61, %v1142_v48  ;;  %v570_v7 = vmul.f32 %v562_v63, %v1156_v52  ;;  %v558_v10 = vld [vmem:[%s1167_s12 + $0x30] sm:$0xff]  ;;  %v1197_v11 = vld [vmem:[%s1139_s25 + $0x28] sm:$0xff]  ;;  %v565_v12 = vsub.f32 %v1182_v2, %v557_v3  ;;  %v571_v13 = vmul.f32 %v563_v0, %v1179_v1  ;;  %v1202_v15 = vld [vmem:[%s1144_s26 + $0x38] sm:$0xff] }
  0x58   : > { %v559_v16 = vld [vmem:[%s1167_s12 + $0x38] sm:$0xff]  ;;  %v891_v17 = vld [vmem:[%s1144_s26 + $0x40] sm:$0xff]  ;;  %v566_v18 = vsub.f32 %v1193_v9, %v558_v10  ;;  %v572_v19 = vmul.f32 %v564_v5, %v1190_v8  ;;  %v892_v21 = vld [vmem:[%s1144_s26 + $0x48] sm:$0xff]  ;;  %v600_v63 = vmul.f32 %v1142_v48, %v1142_v48  ;;  %v601_v0 = vmul.f32 %v1153_v51, %v1153_v51 }
  0x59   : > { %v576_v14 = vadd.f32 %v569_v6, %v568_v4  ;;  %v899_v22 = vld [vmem:[%s1167_s12 + $0x40] sm:$0xff]  ;;  %v900_v23 = vld [vmem:[%s1167_s12 + $0x48] sm:$0xff]  ;;  %v1212_v24 = vld [vmem:[%s1139_s25 + $0x30] sm:$0xff]  ;;  %v567_v25 = vsub.f32 %v1202_v15, %v559_v16  ;;  %v573_v26 = vmul.f32 %v565_v12, %v1197_v11  ;;  %v621_v48 = vmul.f32 %v1147_v49, %v1147_v49 }
  0x5a   : > { %v893_v28 = vld [vmem:[%s1144_s26 + $0x50] sm:$0xff]  ;;  %v1219_v30 = vld [vmem:[%s1139_s25 + $0x38] sm:$0xff]  ;;  %v883_v31 = vld [vmem:[%s1139_s25 + $0x40] sm:$0xff]  ;;  %v669_v32 = vsub.f32 %v891_v17, %v899_v22  ;;  %v670_v33 = vsub.f32 %v892_v21, %v900_v23  ;;  %v574_v34 = vmul.f32 %v566_v18, %v1212_v24  ;;  %v709_v51 = vmul.f32 %v892_v21, %v892_v21 }
  0x5b   : > { %v577_v20 = vadd.f32 %v576_v14, %v570_v7  ;;  %v901_v29 = vld [vmem:[%s1167_s12 + $0x50] sm:$0xff]  ;;  %v884_v36 = vld [vmem:[%s1139_s25 + $0x48] sm:$0xff]  ;;  %v894_v37 = vld [vmem:[%s1144_s26 + $0x58] sm:$0xff]  ;;  %v575_v40 = vmul.f32 %v567_v25, %v1219_v30  ;;  %v708_v14 = vmul.f32 %v891_v17, %v891_v17 }
  0x5c   : > { %v902_v38 = vld [vmem:[%s1167_s12 + $0x58] sm:$0xff]  ;;  %v671_v39 = vsub.f32 %v893_v28, %v901_v29  ;;  %v885_v42 = vld [vmem:[%s1139_s25 + $0x50] sm:$0xff]  ;;  %v895_v43 = vld [vmem:[%s1144_s26 + $0x60] sm:$0xff]  ;;  %v677_v46 = vmul.f32 %v883_v31, %v669_v32  ;;  %v678_v47 = vmul.f32 %v884_v36, %v670_v33  ;;  %v710_v32 = vmul.f32 %v893_v28, %v893_v28 }
  0x5d   : > { %v578_v27 = vadd.f32 %v577_v20, %v571_v13  ;;  %v903_v44 = vld [vmem:[%s1167_s12 + $0x60] sm:$0xff]  ;;  %v672_v45 = vsub.f32 %v894_v37, %v902_v38  ;;  %v886_v57 = vld [vmem:[%s1139_s25 + $0x58] sm:$0xff]  ;;  %v1232_v58 = vld [vmem:[%s1144_s26 + $0x68] sm:$0xff]  ;;  %v716_v33 = vadd.f32 %v709_v51, %v708_v14  ;;  %v624_v28 = vmul.f32 %v1162_v54, %v1162_v54 }
  0x5e   : > { %v904_v59 = vld [vmem:[%s1167_s12 + $0x68] sm:$0xff]  ;;  %v673_v60 = vsub.f32 %v895_v43, %v903_v44  ;;  %v679_v61 = vmul.f32 %v885_v42, %v671_v39  ;;  %v887_v3 = vld [vmem:[%s1139_s25 + $0x60] sm:$0xff]  ;;  %v1241_v4 = vld [vmem:[%s1144_s26 + $0x70] sm:$0xff]  ;;  %v685_v13 = vadd.f32 %v678_v47, %v677_v46  ;;  %v711_v44 = vmul.f32 %v894_v37, %v894_v37 }
  0x5f   : > { %v579_v35 = vadd.f32 %v578_v27, %v572_v19  ;;  %v905_v5 = vld [vmem:[%s1167_s12 + $0x70] sm:$0xff]  ;;  %v1245_v6 = vld [vmem:[%s1144_s26 + $0x78] sm:$0xff]  ;;  %v674_v10 = vsub.f32 %v1232_v58, %v904_v59  ;;  %v680_v12 = vmul.f32 %v886_v57, %v672_v45  ;;  %v888_v18 = vld [vmem:[%s1139_s25 + $0x68] sm:$0xff]  ;;  %v622_v19 = vmul.f32 %v1150_v50, %v1150_v50 }
  0x60   : > { %v906_v7 = vld [vmem:[%s1167_s12 + $0x78] sm:$0xff]  ;;  %v675_v20 = vsub.f32 %v1241_v4, %v905_v5  ;;  %v681_v22 = vmul.f32 %v887_v3, %v673_v60  ;;  %v686_v23 = vadd.f32 %v685_v13, %v679_v61  ;;  %v608_v27 = vadd.f32 %v601_v0, %v600_v63  ;;  %v889_v17 = vld [vmem:[%s1139_s25 + $0x70] sm:$0xff] }
  0x61   : > { %v580_v41 = vadd.f32 %v579_v35, %v573_v26  ;;  %v602_v26 = vmul.f32 %v1156_v52, %v1156_v52  ;;  %v676_v29 = vsub.f32 %v1245_v6, %v906_v7  ;;  %v682_v31 = vmul.f32 %v888_v18, %v674_v10 }
  0x62   : > { %v687_v49 = vadd.f32 %v686_v23, %v680_v12  ;;  %v623_v50 = vmul.f32 %v1159_v53, %v1159_v53  ;;  %v629_v35 = vadd.f32 %v622_v19, %v621_v48  ;;  %v683_v36 = vmul.f32 %v889_v17, %v675_v20 }
  0x63   : > { %v581_v56 = vadd.f32 %v580_v41, %v574_v34  ;;  %v890_v34 = vld [vmem:[%s1139_s25 + $0x78] sm:$0xff]  ;;  %v603_v52 = vmul.f32 %v1179_v1, %v1179_v1  ;;  %v717_v45 = vadd.f32 %v716_v33, %v710_v32  ;;  %v604_v53 = vmul.f32 %v1190_v8, %v1190_v8 }
  0x64   : > { %v688_v38 = vadd.f32 %v687_v49, %v681_v22  ;;  %v684_v41 = vmul.f32 %v890_v34, %v676_v29  ;;  %v630_v47 = vadd.f32 %v629_v35, %v623_v50  ;;  %v712_v61 = vmul.f32 %v895_v43, %v895_v43 }
  0x65   : > { %v582_v62 = vadd.f32 %v581_v56, %v575_v40  ;;  %v609_v40 = vadd.f32 %v608_v27, %v602_v26  ;;  %v625_v63 = vmul.f32 %v1165_v55, %v1165_v55  ;;  %v605_v54 = vmul.f32 %v1197_v11, %v1197_v11 }
  0x66   : > { %v689_v42 = vadd.f32 %v688_v38, %v682_v31  ;;  %v631_v37 = vadd.f32 %v630_v47, %v624_v28  ;;  %v713_v10 = vmul.f32 %v1232_v58, %v1232_v58  ;;  %v626_v43 = vmul.f32 %v1182_v2, %v1182_v2 }
  0x67   : > { %v583_v16 = vrot.slane %v582_v62, 4  ;;  %v610_v59 = vadd.f32 %v609_v40, %v603_v52  ;;  %v606_v55 = vmul.f32 %v1212_v24, %v1212_v24  ;;  %v714_v11 = vmul.f32 %v1241_v4, %v1241_v4 }
  0x68   : > { %v690_v56 = vadd.f32 %v689_v42, %v683_v36  ;;  %v632_v13 = vadd.f32 %v631_v37, %v625_v63  ;;  %v627_v58 = vmul.f32 %v1193_v9, %v1193_v9  ;;  %v607_v2 = vmul.f32 %v1219_v30, %v1219_v30 }
  0x69   : > { %v584_v25 = vadd.f32 %v583_v16, %v582_v62  ;;  %v718_v62 = vadd.f32 %v717_v45, %v711_v44  ;;  %v611_v5 = vadd.f32 %v610_v59, %v604_v53  ;;  %v715_v24 = vmul.f32 %v1245_v6, %v1245_v6 }
  0x6a   : > { %v691_v60 = vadd.f32 %v690_v56, %v684_v41  ;;  %v633_v51 = vadd.f32 %v632_v13, %v626_v43  ;;  %v628_v4 = vmul.f32 %v1202_v15, %v1202_v15  ;;  %v525_v49 = vlaneseq }
  0x6b   : > { %v585_v21 = vrot.slane %v584_v25, 2  ;;  %v719_v8 = vadd.f32 %v718_v62, %v712_v61  ;;  %v612_v16 = vadd.f32 %v611_v5, %v605_v54  ;;  %v527_v50 = vstv %s880_s27 }
  0x6c   : > { %v692_v0 = vrot.slane %v691_v60, 4  ;;  %v634_v26 = vadd.f32 %v633_v51, %v627_v58  ;;  %v526_v6 = vand.u32 127, %v525_v49  ;;  %v734_v62 = vshrl.u32 %v525_v49, 7 }
  0x6d   : > { %v586_v39 = vadd.f32 %v585_v21, %v584_v25  ;;  %v720_v18 = vadd.f32 %v719_v8, %v713_v10  ;;  %v613_v20 = vadd.f32 %v612_v16, %v606_v55 }
  0x6e   : > { %v693_v7 = vadd.f32 %v692_v0, %v691_v60  ;;  %v635_v32 = vadd.f32 %v634_v26, %v628_v4  ;;  %v528_v52 = vadd.s32 %v527_v50, %v526_v6  ;;  %v998_v60 = vmov 0.0  }
  0x6f   : > { %v587_v46 = vrot.slane %v586_v39, 1  ;;  %v721_v23 = vadd.f32 %v720_v18, %v714_v11  ;;  %v614_v9 = vadd.f32 %v613_v20, %v607_v2  ;;  %vm735_vm2 = vcmp.eq.s32.totalorder %v734_v62, 0 }
  0x70   : > { %v694_v14 = vrot.slane %v693_v7, 2  ;;  %v636_v34 = vrot.slane %v635_v32, 4  ;;  %vm529_vm0 = vcmp.lt.s32.totalorder %v528_v52, 8  ;;  %vm532_vm1 = vcmp.lt.s32.totalorder %v528_v52, 4 }
  0x71   : > { %v588_v57 = vadd.f32 %v587_v46, %v586_v39  ;;  %v722_v31 = vadd.f32 %v721_v23, %v715_v24  ;;  %v615_v33 = vrot.slane %v614_v9, 4  ;;  %v882_v61 = vsel %vm532_vm1, 1.0, %v998_v60 }
  0x72   : > { %v695_v48 = vadd.f32 %v694_v14, %v693_v7  ;;  %v637_v40 = vadd.f32 %v636_v34, %v635_v32  ;;  %vm738_vm3 = vcmp.eq.s32.totalorder %v734_v62, 1  ;;  %vm741_vm4 = vcmp.eq.s32.totalorder %v734_v62, 2 }
  0x73   : > { %v591_v1 = vand.u32 2147483647, %v588_v57  ;;  %v723_v21 = vrot.slane %v722_v31, 4  ;;  %v616_v35 = vadd.f32 %v615_v33, %v614_v9  ;;  %v589_v36 = vsub.f32 0.0, %v588_v57 }
  0x74   : > { %v696_v19 = vrot.slane %v695_v48, 1  ;;  %v638_v28 = vrot.slane %v637_v40, 2  ;;  %v881_v57 = vsel %vm529_vm0, 1.0, %v998_v60  ;;  %vm744_vm5 = vcmp.eq.s32.totalorder %v734_v62, 3 }
  0x75   : > { %v592_v3 = vsub.f32 0.0, %v591_v1  ;;  %v724_v15 = vadd.f32 %v723_v21, %v722_v31  ;;  %v617_v41 = vrot.slane %v616_v35, 2  ;;  %v590_v44 = vmax.f32 %v589_v36, 0.0 }
  0x76   : > { %v697_v22 = vadd.f32 %v696_v19, %v695_v48  ;;  %v639_v1 = vadd.f32 %v638_v28, %v637_v40  ;;  %vm747_vm6 = vcmp.eq.s32.totalorder %v734_v62, 4  ;;  %vm750_vm7 = vcmp.eq.s32.totalorder %v734_v62, 5 }
  0x77   : > { %v593_v12 = vmul.f32 1.442695, %v592_v3  ;;  %v725_v46 = vrot.slane %v724_v15, 2  ;;  %v618_v56 = vadd.f32 %v617_v41, %v616_v35  ;;  %v535_v3 = vsub.f32 %v881_v57, %v882_v61 }
  0x78   : > { %v700_v27 = vand.u32 2147483647, %v697_v22  ;;  %v698_v47 = vsub.f32 0.0, %v697_v22  ;;  %v640_v10 = vrot.slane %v639_v1, 1  ;;  %vm753_vm8 = vcmp.eq.s32.totalorder %v734_v62, 6 }
  0x79   : > { %950 = vpow2.f32 %v593_v12  ;;  %v726_v59 = vadd.f32 %v725_v46, %v724_v15  ;;  %v619_v0 = vrot.slane %v618_v56, 1 }
  0x7a   : > { %v701_v29 = vsub.f32 0.0, %v700_v27  ;;  %v699_v63 = vmax.f32 %v698_v47, 0.0  ;;  %v641_v16 = vadd.f32 %v640_v10, %v639_v1 }
  0x7b   : > { %v727_v7 = vrot.slane %v726_v59, 1  ;;  %v620_v12 = vadd.f32 %v619_v0, %v618_v56 }
  0x7c   : > { %v702_v30 = vmul.f32 1.442695, %v701_v29  ;;  %v748_v20 = vsel %vm747_vm6, %v641_v16, 0.0 }
  0x7d   : > { %v728_v43 = vadd.f32 %v727_v7, %v726_v59  ;;  %v745_v51 = vsel %vm744_vm5, %v620_v12, 0.0 }
  0x7f   : > { %v951_v25 = vpop.eup %950  ;;  %v731_v58 = vmul.f32 %v882_v61, %v728_v43  ;;  %v732_v2 = vmul.f32 %v728_v43, %v535_v3 }
  0x80   : > { %v595_v17 = vadd.f32 1.0, %v951_v25 }
  0x81   : > { %v751_v24 = vsel %vm750_vm7, %v731_v58, 0.0  ;;  %v754_v25 = vsel %vm753_vm8, %v732_v2, 0.0 }
  0x82   : > { %952 = vlog2.f32 %v595_v17 }
  0x83   : > { %954 = vpow2.f32 %v702_v30 }
  0x88   : > { %v953_v38 = vpop.eup %952 }
  0x89   : > { %v955_v39 = vpop.eup %954  ;;  %v597_v45 = vmul.f32 0.6931472, %v953_v38 }
  0x8a   : > { %v704_v42 = vadd.f32 1.0, %v955_v39 }
  0x8b   : > { %v598_v53 = vadd.f32 %v597_v45, %v590_v44 }
  0x8c   : > { %956 = vlog2.f32 %v704_v42 }
  0x8d   : > { %v599_v54 = vmul.f32 %v881_v57, %v598_v53 }
  0x8f   : > { %v736_v55 = vsel %vm735_vm2, %v599_v54, 0.0 }
  0x92   : > { %v957_v37 = vpop.eup %956 }
  0x93   : > { %v706_v5 = vmul.f32 0.6931472, %v957_v37 }
  0x95   : > { %v707_v8 = vadd.f32 %v706_v5, %v699_v63 }
  0x97   : > { %v729_v13 = vmul.f32 %v882_v61, %v707_v8  ;;  %v730_v14 = vmul.f32 %v707_v8, %v535_v3 }
  0x99   : > { %v739_v48 = vsel %vm738_vm3, %v729_v13, 0.0  ;;  %v742_v11 = vsel %vm741_vm4, %v730_v14, 0.0 }
  0x9a   : > { %v740_v18 = vadd.f32 %v739_v48, %v736_v55 }
  0x9c   : > { %v743_v19 = vadd.f32 %v742_v11, %v740_v18 }
  0x9e   : > { %v746_v22 = vadd.f32 %v745_v51, %v743_v19 }
  0xa0   : > { %v749_v23 = vadd.f32 %v748_v20, %v746_v22 }
  0xa2   : > { %v752_v4 = vadd.f32 %v751_v24, %v749_v23 }
  0xa4   : > { %v755_v26 = vadd.f32 %v754_v25, %v752_v4 }
  0xa6   : > { %758 = vst [vmem:[%s517_s4] sm:$0xff] %v755_v26 }
  0xa7 PF: > { %s13_s16 = sadd.s32 1, %s996_s16   ;;  %s1314_s12 = smov %s984_s13 }
  0xa8   : > { %p10_p10 = scmp.ge.s32.totalorder %s13_s16, 4   ;;  %s1315_s13 = smov %s1058_s21 }
  0xa9   : > { %s1316_s14 = smov %s992_s15  ;;  %s1317_s15 = smov %s1319_s17 }
  0xaa   :  { %12 = sbr.rel (!%p10_p10) target bundleno = 3 (0x3), region = 204 }

</bundles_post_ra>
